<compile_context>
chip_gen: v6e
topology: v6e:2x2x1
jax: 0.10.0
libtpu: 0.0.40
codegen_flags: <defaults>
</compile_context>

<pallas_src>
import functools
import math

import jax
import jax.numpy as jnp
from jax import lax
from jax.experimental import pallas as pl
from jax.experimental.pallas import tpu as pltpu

_LOG_EPS = math.log(1e-6)
_NEG_BIG = -1e30


def _ncl_kernel(q_ref, queue_ref, pid_q_ref, t_q_ref, pid_k_ref, t_k_ref,
                out_ref,
                m_sc, l_sc, nexp_sc, nlogit_sc, count_sc, pos_sc,
                amax_val_sc, amax_idx_sc,
                *, temperature, threshold, k_true, tiles_per_split):
    c = pl.program_id(0)        # K-range split (parallel; one per TensorCore on v7x)
    kstep = pl.program_id(1)    # K tile within this split (reduction axis)
    B = q_ref.shape[0]
    TK = queue_ref.shape[0]
    inv_t = 1.0 / temperature

    @pl.when(kstep == 0)
    def _init():
        m_sc[...] = jnp.full((B, 1), _NEG_BIG, jnp.float32)
        l_sc[...] = jnp.zeros((B, 1), jnp.float32)
        nexp_sc[...] = jnp.zeros((B, 1), jnp.float32)
        nlogit_sc[...] = jnp.zeros((B, 1), jnp.float32)
        count_sc[...] = jnp.zeros((B, 1), jnp.float32)
        pos_sc[...] = jnp.zeros((B, 1), jnp.float32)
        amax_val_sc[...] = jnp.full((B, 1), _NEG_BIG, jnp.float32)
        amax_idx_sc[...] = jnp.zeros((B, 1), jnp.int32)

    # ---- hot path: (B, TK) similarity logits on the MXU (contract D, no on-chip
    # transpose); f32 accumulation regardless of the streamed operand dtype (bf16 ok).
    logits = lax.dot_general(q_ref[...], queue_ref[...],
                             (((1,), (1,)), ((), ())),
                             preferred_element_type=jnp.float32) * inv_t

    # ---- ragged / padded-column validity, kept at (1, TK): one iota + one compare
    # against a scalar remainder instead of a full (B, TK) global-column tensor.
    col = lax.broadcasted_iota(jnp.int32, (1, TK), 1)          # (1, TK)
    tile_off = (c * tiles_per_split + kstep) * TK              # scalar
    valid = col < (k_true - tile_off)                          # (1, TK) bool

    # ---- neighborhood mask (boolean) for this tile --------------------------------
    nmask = ((pid_q_ref[...] == pid_k_ref[...])
             & (jnp.abs(t_q_ref[...] - t_k_ref[...]) <= threshold)
             & valid)                                          # (B, TK)

    # ---- positives: diagonal of the global first tile (queue[:B] are the positives;
    # requires tk >= B, asserted in the wrapper) -------------------------------------
    @pl.when((c == 0) & (kstep == 0))
    def _pos():
        row_id = lax.broadcasted_iota(jnp.int32, (B, TK), 0)
        pos_sc[...] = jnp.sum(jnp.where(col == row_id, logits, 0.0),
                              axis=1, keepdims=True)

    # ---- online softmax / masked-sum statistics (single exp sweep per tile) --------
    masked_logits = jnp.where(valid, logits, jnp.float32(_NEG_BIG))
    m_tile = jnp.max(masked_logits, axis=1, keepdims=True)     # (B, 1)
    m_old = m_sc[...]
    m_new = jnp.maximum(m_old, m_tile)
    corr = jnp.exp(m_old - m_new)                              # (B, 1)
    p = jnp.exp(masked_logits - m_new)                         # (B, TK)
    l_sc[...] = corr * l_sc[...] + jnp.sum(p, axis=1, keepdims=True)
    nexp_sc[...] = corr * nexp_sc[...] + jnp.sum(jnp.where(nmask, p, 0.0),
                                                 axis=1, keepdims=True)
    nlogit_sc[...] = nlogit_sc[...] + jnp.sum(jnp.where(nmask, logits, 0.0),
                                              axis=1, keepdims=True)
    count_sc[...] = count_sc[...] + jnp.sum(jnp.where(nmask, 1.0, 0.0),
                                            axis=1, keepdims=True)
    m_sc[...] = m_new

    # ---- running argmax (first-index tie-break across and within tiles) ------------
    global_col = col + tile_off                                # (1, TK)
    tile_idx = jnp.min(
        jnp.where(masked_logits == m_tile, global_col, jnp.int32(2 ** 30)),
        axis=1, keepdims=True)
    better = m_tile > amax_val_sc[...]
    amax_val_sc[...] = jnp.where(better, m_tile, amax_val_sc[...])
    amax_idx_sc[...] = jnp.where(better, tile_idx, amax_idx_sc[...])

    # ---- write this split's raw statistics as a lane-dense (B, 128) slab -----------
    @pl.when(kstep == pl.num_programs(1) - 1)
    def _finalize():
        lane = lax.broadcasted_iota(jnp.int32, (B, 128), 1)
        vals = (m_sc[...], l_sc[...], nexp_sc[...], nlogit_sc[...],
                count_sc[...], pos_sc[...], amax_val_sc[...],
                amax_idx_sc[...].astype(jnp.float32))
        slab = jnp.zeros((B, 128), jnp.float32)
        for i, v in enumerate(vals):
            slab = jnp.where(lane == i, v, slab)
        out_ref[...] = slab


def _round_up(x, m):
    return (x + m - 1) // m * m


def ncl_loss(q, queue, labels_q, labels_queue, *, temperature=1.0, alpha=0.5,
             threshold=8, compute_dtype=jnp.bfloat16, block_k=None,
             tile_bytes=2 * 1024 * 1024, num_splits=2, vmem_limit_bytes=None):
    """Pallas implementation of NCLLoss.forward. Returns (total, agg, disc, acc)."""
    B, D = q.shape
    K, Dk = queue.shape
    assert D == Dk
    assert K >= B, "NCL assumes the first B queue rows are the positives for q"

    compute_dtype = jnp.dtype(compute_dtype) if compute_dtype is not None else q.dtype
    dbytes = compute_dtype.itemsize

    # Pad B to a sublane multiple and D to a lane multiple (MXU / DMA efficiency).
    B_pad = _round_up(B, 8)
    D_pad = _round_up(D, 128)

    # K tile sized by bytes (amortizes the per-grid-step overhead); must be a multiple
    # of 128 lanes and >= B so the positive diagonal lies within the first tile.
    if block_k is None:
        tk = max(128, int(tile_bytes) // (D_pad * dbytes))
    else:
        tk = int(block_k)
    tk = _round_up(tk, 128)
    tk = min(tk, _round_up(K, 128))
    tk = max(tk, _round_up(B, 128))
    assert tk >= B, "K tile must cover the positive diagonal (tk >= B)"

    num_k_total = -(-K // tk)
    num_splits = max(1, min(int(num_splits), num_k_total))
    tiles_per_split = -(-num_k_total // num_splits)
    k_pad = num_splits * tiles_per_split * tk

    # Stream operands at compute_dtype (bf16 halves HBM traffic; dot accumulates f32).
    q_c = q.astype(compute_dtype)
    queue_c = queue.astype(compute_dtype)
    if B_pad != B or D_pad != D:
        q_c = jnp.pad(q_c, ((0, B_pad - B), (0, D_pad - D)))
    if k_pad != K or D_pad != D:
        queue_c = jnp.pad(queue_c, ((0, k_pad - K), (0, D_pad - D)))

    pid_q = labels_q[:, 0:1].astype(jnp.int32)                 # (B, 1)
    t_q = labels_q[:, 1:2].astype(jnp.int32)
    if B_pad != B:
        pid_q = jnp.pad(pid_q, ((0, B_pad - B), (0, 0)), constant_values=-1)
        t_q = jnp.pad(t_q, ((0, B_pad - B), (0, 0)), constant_values=-(10 ** 6))
    pid_k = labels_queue[:, 0].astype(jnp.int32)               # (K,)
    t_k = labels_queue[:, 1].astype(jnp.int32)
    if k_pad != K:
        pid_k = jnp.pad(pid_k, (0, k_pad - K), constant_values=-1)
        t_k = jnp.pad(t_k, (0, k_pad - K), constant_values=-(10 ** 6))
    pid_k = pid_k.reshape(1, k_pad)
    t_k = t_k.reshape(1, k_pad)

    if vmem_limit_bytes is None:
        # double-buffered queue tile + resident q + f32 (B, tk) body temporaries;
        # capped at 64 MiB so a tuned v5e/v6e config still fits v7x's smaller VMEM.
        need = (2 * tk * D_pad * dbytes
                + 2 * B_pad * D_pad * dbytes
                + 6 * B_pad * tk * 4)
        vmem_limit_bytes = int(min(64 * 1024 * 1024,
                                   max(32 * 1024 * 1024, 2 * need)))

    kernel = functools.partial(
        _ncl_kernel, temperature=float(temperature), threshold=int(threshold),
        k_true=int(K), tiles_per_split=int(tiles_per_split))

    stats = pl.pallas_call(
        kernel,
        out_shape=jax.ShapeDtypeStruct((num_splits, B_pad, 128), jnp.float32),
        grid_spec=pltpu.PrefetchScalarGridSpec(
            num_scalar_prefetch=0,
            grid=(num_splits, tiles_per_split),
            in_specs=[
                pl.BlockSpec((B_pad, D_pad), lambda c, k: (0, 0)),   # q (resident)
                pl.BlockSpec((tk, D_pad),
                             lambda c, k: (c * tiles_per_split + k, 0)),  # queue tile
                pl.BlockSpec((B_pad, 1), lambda c, k: (0, 0)),       # pid_q (resident)
                pl.BlockSpec((B_pad, 1), lambda c, k: (0, 0)),       # t_q   (resident)
                pl.BlockSpec((1, tk),
                             lambda c, k: (0, c * tiles_per_split + k)),  # pid_k tile
                pl.BlockSpec((1, tk),
                             lambda c, k: (0, c * tiles_per_split + k)),  # t_k tile
            ],
            out_specs=pl.BlockSpec((None, B_pad, 128), lambda c, k: (c, 0, 0)),
            scratch_shapes=[pltpu.VMEM((B_pad, 1), jnp.float32)] * 7
                         + [pltpu.VMEM((B_pad, 1), jnp.int32)]),
        compiler_params=pltpu.CompilerParams(
            dimension_semantics=("parallel", "arbitrary"),
            vmem_limit_bytes=vmem_limit_bytes),
    )(q_c, queue_c, pid_q, t_q, pid_k, t_k)

    # ---- merge per-split online statistics in the wrapper (tiny, O(splits * B)) ----
    s = stats[:, :B, :]                        # (C, B, 128)
    m_c, l_c, nexp_c = s[..., 0], s[..., 1], s[..., 2]
    nlogit = jnp.sum(s[..., 3], axis=0)
    count = jnp.maximum(jnp.sum(s[..., 4], axis=0), 1.0)
    pos = s[0, :, 5]                           # split 0 owns the global first tile
    aval_c, aidx_c = s[..., 6], s[..., 7]

    m = jnp.max(m_c, axis=0)
    scale = jnp.exp(m_c - m[None, :])
    l = jnp.sum(l_c * scale, axis=0)
    nexp = jnp.sum(nexp_c * scale, axis=0)
    aval = jnp.max(aval_c, axis=0)
    aidx = jnp.min(jnp.where(aval_c == aval[None, :], aidx_c, jnp.inf), axis=0)

    lse = m + jnp.log(l)
    agg = jnp.mean(lse - nlogit / count)
    # log(clamp(sum(exp(logits) * mask), 1e-6)) == max(m + log(nexp), log(1e-6))
    disc = jnp.mean(jnp.maximum(m + jnp.log(nexp), _LOG_EPS) - pos)
    acc = jnp.mean((aidx == jnp.arange(B, dtype=jnp.float32)).astype(jnp.float32))
    total = alpha * agg + (1.0 - alpha) * disc
    return total, agg, disc, acc


def ncl_loss_ref(q, queue, labels_q, labels_queue,
                 temperature=1.0, alpha=0.5, threshold=8):
    """Plain-JAX reference matching the PyTorch module."""
    B, _ = q.shape
    logits = (q @ queue.T) / temperature
    pos = jnp.sum(q * queue[:B], axis=1) / temperature
    pid_q = labels_q[:, 0][:, None]
    t_q = labels_q[:, 1][:, None]
    pid_k = labels_queue[:, 0][None, :]
    t_k = labels_queue[:, 1][None, :]
    mask = ((pid_q == pid_k) & (jnp.abs(t_q - t_k) <= threshold)).astype(jnp.float32)
    count = jnp.maximum(mask.sum(1), 1.0)
    lse = jax.scipy.special.logsumexp(logits, axis=1)
    exp_n = (logits * mask).sum(1) / count
    agg = jnp.mean(lse - exp_n)
    exp_n_log = jnp.log(jnp.maximum((jnp.exp(logits) * mask).sum(1), 1e-6))
    disc = jnp.mean(exp_n_log - pos)
    total = alpha * agg + (1.0 - alpha) * disc
    acc = jnp.mean((jnp.argmax(logits, axis=1) == jnp.arange(B)).astype(jnp.float32))
    return total, agg, disc, acc


if __name__ == "__main__":
    # K=200 with block_k=128 and num_splits=2 -> 2 K tiles, one per split,
    # ragged last tile; exercises the split merge, the diagonal positives,
    # and the padded-column validity mask.
    B, D, K = 8, 32, 200
    key = jax.random.PRNGKey(0)
    kq, kn, kp, kt, kr = jax.random.split(key, 5)

    q = jax.random.normal(kq, (B, D), dtype=jnp.float32)
    queue_tail = jax.random.normal(kr, (K - B, D), dtype=jnp.float32)
    # first B queue entries are the (slightly noised) positives for q
    queue = jnp.concatenate(
        [q + 0.05 * jax.random.normal(kn, (B, D), dtype=jnp.float32), queue_tail],
        axis=0)

    pids = jax.random.randint(kp, (K,), 0, 3, dtype=jnp.int32)
    times = jax.random.randint(kt, (K,), 0, 24, dtype=jnp.int32)
    labels_queue = jnp.stack([pids, times], axis=1)    # (K, 2)
    labels_q = labels_queue[:B]                        # (B, 2)

    out = ncl_loss(q, queue, labels_q, labels_queue,
                   temperature=1.0, alpha=0.5, threshold=8,
                   block_k=128, num_splits=2)
    out = jax.block_until_ready(out)

    # Reference on bf16-rounded operands (the kernel streams bf16, accumulates f32).
    q_r = q.astype(jnp.bfloat16).astype(jnp.float32)
    queue_r = queue.astype(jnp.bfloat16).astype(jnp.float32)
    ref = ncl_loss_ref(q_r, queue_r, labels_q, labels_queue,
                       temperature=1.0, alpha=0.5, threshold=8)
    ref = jax.block_until_ready(ref)

    for got, want in zip(out, ref):
        assert jnp.allclose(got, want, atol=2e-3, rtol=2e-3), (got, want)

    print("KERNEL_OK")
</pallas_src>

<mosaic_0001>
module attributes {stable_mosaic.version = 11 : i64} {
  func.func @_ncl_kernel(%arg0: i32, %arg1: i32, %arg2: memref<8x128xbf16, #tpu.memory_space<vmem>>, %arg3: memref<128x128xbf16, #tpu.memory_space<vmem>>, %arg4: memref<8x1xi32, #tpu.memory_space<vmem>>, %arg5: memref<8x1xi32, #tpu.memory_space<vmem>>, %arg6: memref<1x128xi32, #tpu.memory_space<vmem>>, %arg7: memref<1x128xi32, #tpu.memory_space<vmem>>, %arg8: memref<1x8x128xf32, #tpu.memory_space<vmem>>, %arg9: memref<8x1xf32, #tpu.memory_space<vmem>>, %arg10: memref<8x1xf32, #tpu.memory_space<vmem>>, %arg11: memref<8x1xf32, #tpu.memory_space<vmem>>, %arg12: memref<8x1xf32, #tpu.memory_space<vmem>>, %arg13: memref<8x1xf32, #tpu.memory_space<vmem>>, %arg14: memref<8x1xf32, #tpu.memory_space<vmem>>, %arg15: memref<8x1xf32, #tpu.memory_space<vmem>>, %arg16: memref<8x1xi32, #tpu.memory_space<vmem>>) attributes {dimension_semantics = [#tpu.dimension_semantics<parallel>, #tpu.dimension_semantics<arbitrary>], iteration_bounds = array<i64: 2, 1>, scalar_prefetch = 0 : i64, scratch_operands = 8 : i64, tpu.core_type = #tpu.core_type<tc>, window_params = [{pipeline_mode = #tpu.pipeline_mode<synchronous>, transform_indices = @transform_0, window_bounds = array<i64: 8, 128>}, {transform_indices = @transform_1, window_bounds = array<i64: 128, 128>}, {pipeline_mode = #tpu.pipeline_mode<synchronous>, transform_indices = @transform_2, window_bounds = array<i64: 8, 1>}, {pipeline_mode = #tpu.pipeline_mode<synchronous>, transform_indices = @transform_3, window_bounds = array<i64: 8, 1>}, {transform_indices = @transform_4, window_bounds = array<i64: 1, 128>}, {transform_indices = @transform_5, window_bounds = array<i64: 1, 128>}, {transform_indices = @transform_6, window_bounds = array<i64: 1, 8, 128>}]} {
    %c0_i32 = arith.constant 0 : i32
    %0 = arith.cmpi eq, %arg1, %c0_i32 : i32
    %1 = arith.extui %0 : i1 to i32
    %c0_i32_0 = arith.constant 0 : i32
    %2 = arith.cmpi ne, %1, %c0_i32_0 : i32
    scf.if %2 {
      %cst_59 = arith.constant -1.000000e+30 : f32
      %100 = vector.broadcast %cst_59 : f32 to vector<8x1xf32>
      %c0_60 = arith.constant 0 : index
      %c0_61 = arith.constant 0 : index
      %101 = vector.load %arg9[%c0_60, %c0_61] : memref<8x1xf32, #tpu.memory_space<vmem>>, vector<8x1xf32>
      tpu.vector_store %arg9[%c0_60, %c0_61], %100 {strides = array<i32>} : memref<8x1xf32, #tpu.memory_space<vmem>>, vector<8x1xf32>,
      %cst_62 = arith.constant 0.000000e+00 : f32
      %102 = vector.broadcast %cst_62 : f32 to vector<8x1xf32>
      %c0_63 = arith.constant 0 : index
      %c0_64 = arith.constant 0 : index
      %103 = vector.load %arg10[%c0_63, %c0_64] : memref<8x1xf32, #tpu.memory_space<vmem>>, vector<8x1xf32>
      tpu.vector_store %arg10[%c0_63, %c0_64], %102 {strides = array<i32>} : memref<8x1xf32, #tpu.memory_space<vmem>>, vector<8x1xf32>,
      %cst_65 = arith.constant 0.000000e+00 : f32
      %104 = vector.broadcast %cst_65 : f32 to vector<8x1xf32>
      %c0_66 = arith.constant 0 : index
      %c0_67 = arith.constant 0 : index
      %105 = vector.load %arg11[%c0_66, %c0_67] : memref<8x1xf32, #tpu.memory_space<vmem>>, vector<8x1xf32>
      tpu.vector_store %arg11[%c0_66, %c0_67], %104 {strides = array<i32>} : memref<8x1xf32, #tpu.memory_space<vmem>>, vector<8x1xf32>,
      %cst_68 = arith.constant 0.000000e+00 : f32
      %106 = vector.broadcast %cst_68 : f32 to vector<8x1xf32>
      %c0_69 = arith.constant 0 : index
      %c0_70 = arith.constant 0 : index
      %107 = vector.load %arg12[%c0_69, %c0_70] : memref<8x1xf32, #tpu.memory_space<vmem>>, vector<8x1xf32>
      tpu.vector_store %arg12[%c0_69, %c0_70], %106 {strides = array<i32>} : memref<8x1xf32, #tpu.memory_space<vmem>>, vector<8x1xf32>,
      %cst_71 = arith.constant 0.000000e+00 : f32
      %108 = vector.broadcast %cst_71 : f32 to vector<8x1xf32>
      %c0_72 = arith.constant 0 : index
      %c0_73 = arith.constant 0 : index
      %109 = vector.load %arg13[%c0_72, %c0_73] : memref<8x1xf32, #tpu.memory_space<vmem>>, vector<8x1xf32>
      tpu.vector_store %arg13[%c0_72, %c0_73], %108 {strides = array<i32>} : memref<8x1xf32, #tpu.memory_space<vmem>>, vector<8x1xf32>,
      %cst_74 = arith.constant 0.000000e+00 : f32
      %110 = vector.broadcast %cst_74 : f32 to vector<8x1xf32>
      %c0_75 = arith.constant 0 : index
      %c0_76 = arith.constant 0 : index
      %111 = vector.load %arg14[%c0_75, %c0_76] : memref<8x1xf32, #tpu.memory_space<vmem>>, vector<8x1xf32>
      tpu.vector_store %arg14[%c0_75, %c0_76], %110 {strides = array<i32>} : memref<8x1xf32, #tpu.memory_space<vmem>>, vector<8x1xf32>,
      %cst_77 = arith.constant -1.000000e+30 : f32
      %112 = vector.broadcast %cst_77 : f32 to vector<8x1xf32>
      %c0_78 = arith.constant 0 : index
      %c0_79 = arith.constant 0 : index
      %113 = vector.load %arg15[%c0_78, %c0_79] : memref<8x1xf32, #tpu.memory_space<vmem>>, vector<8x1xf32>
      tpu.vector_store %arg15[%c0_78, %c0_79], %112 {strides = array<i32>} : memref<8x1xf32, #tpu.memory_space<vmem>>, vector<8x1xf32>,
      %c0_i32_80 = arith.constant 0 : i32
      %114 = vector.broadcast %c0_i32_80 : i32 to vector<8x1xi32>
      %c0_81 = arith.constant 0 : index
      %c0_82 = arith.constant 0 : index
      %115 = vector.load %arg16[%c0_81, %c0_82] : memref<8x1xi32, #tpu.memory_space<vmem>>, vector<8x1xi32>
      tpu.vector_store %arg16[%c0_81, %c0_82], %114 {strides = array<i32>} : memref<8x1xi32, #tpu.memory_space<vmem>>, vector<8x1xi32>,
    } else {
    }
    %c0 = arith.constant 0 : index
    %c0_1 = arith.constant 0 : index
    %3 = vector.load %arg2[%c0, %c0_1] : memref<8x128xbf16, #tpu.memory_space<vmem>>, vector<8x128xbf16>
    %c0_2 = arith.constant 0 : index
    %c0_3 = arith.constant 0 : index
    %4 = vector.load %arg3[%c0_2, %c0_3] : memref<128x128xbf16, #tpu.memory_space<vmem>>, vector<128x128xbf16>
    %cst = arith.constant dense<0.000000e+00> : vector<8x128xf32>
    %5 = tpu.matmul %3, %4, %cst {dimension_numbers = #tpu.dot_dimension_numbers<[1], [1], [0], [0], [0, 0, 1, 0], [], []>} : vector<8x128xbf16>, vector<128x128xbf16>, vector<8x128xf32> -> vector<8x128xf32>
    %cst_4 = arith.constant 1.000000e+00 : f32
    %6 = vector.broadcast %cst_4 : f32 to vector<8x128xf32>
    %7 = arith.mulf %5, %6 : vector<8x128xf32>
    %8 = tpu.iota {dimensions = array<i32: 1>} : vector<1x128xi32>
    %c1_i32 = arith.constant 1 : i32
    %9 = arith.muli %arg0, %c1_i32 : i32
    %10 = arith.addi %9, %arg1 : i32
    %c128_i32 = arith.constant 128 : i32
    %11 = arith.muli %10, %c128_i32 : i32
    %c200_i32 = arith.constant 200 : i32
    %12 = arith.subi %c200_i32, %11 : i32
    %13 = vector.broadcast %12 : i32 to vector<1x128xi32>
    %14 = arith.cmpi slt, %8, %13 : vector<1x128xi32>
    %c0_5 = arith.constant 0 : index
    %c0_6 = arith.constant 0 : index
    %15 = vector.load %arg4[%c0_5, %c0_6] : memref<8x1xi32, #tpu.memory_space<vmem>>, vector<8x1xi32>
    %c0_7 = arith.constant 0 : index
    %c0_8 = arith.constant 0 : index
    %16 = vector.load %arg6[%c0_7, %c0_8] : memref<1x128xi32, #tpu.memory_space<vmem>>, vector<1x128xi32>
    %17 = vector.broadcast %15 : vector<8x1xi32> to vector<8x128xi32>
    %18 = vector.broadcast %16 : vector<1x128xi32> to vector<8x128xi32>
    %19 = arith.cmpi eq, %17, %18 : vector<8x128xi32>
    %c0_9 = arith.constant 0 : index
    %c0_10 = arith.constant 0 : index
    %20 = vector.load %arg5[%c0_9, %c0_10] : memref<8x1xi32, #tpu.memory_space<vmem>>, vector<8x1xi32>
    %c0_11 = arith.constant 0 : index
    %c0_12 = arith.constant 0 : index
    %21 = vector.load %arg7[%c0_11, %c0_12] : memref<1x128xi32, #tpu.memory_space<vmem>>, vector<1x128xi32>
    %22 = vector.broadcast %20 : vector<8x1xi32> to vector<8x128xi32>
    %23 = vector.broadcast %21 : vector<1x128xi32> to vector<8x128xi32>
    %24 = arith.subi %22, %23 : vector<8x128xi32>
    %25 = math.absi %24 : vector<8x128xi32>
    %c8_i32 = arith.constant 8 : i32
    %26 = vector.broadcast %c8_i32 : i32 to vector<8x128xi32>
    %27 = arith.cmpi sle, %25, %26 : vector<8x128xi32>
    %28 = arith.andi %19, %27 : vector<8x128xi1>
    %29 = vector.broadcast %14 : vector<1x128xi1> to vector<8x128xi1>
    %30 = arith.andi %28, %29 : vector<8x128xi1>
    %c0_i32_13 = arith.constant 0 : i32
    %31 = arith.cmpi eq, %arg0, %c0_i32_13 : i32
    %c0_i32_14 = arith.constant 0 : i32
    %32 = arith.cmpi eq, %arg1, %c0_i32_14 : i32
    %33 = arith.andi %31, %32 : i1
    %34 = arith.extui %33 : i1 to i32
    %c0_i32_15 = arith.constant 0 : i32
    %35 = arith.cmpi ne, %34, %c0_i32_15 : i32
    scf.if %35 {
      %100 = tpu.iota {dimensions = array<i32: 0>} : vector<8x128xi32>
      %101 = vector.broadcast %8 : vector<1x128xi32> to vector<8x128xi32>
      %102 = arith.cmpi eq, %101, %100 : vector<8x128xi32>
      %cst_59 = arith.constant 0.000000e+00 : f32
      %103 = vector.broadcast %cst_59 : f32 to vector<8x128xf32>
      %104 = arith.select %102, %7, %103 : vector<8x128xi1>, vector<8x128xf32>
      %cst_60 = arith.constant dense<0.000000e+00> : vector<8xf32>
      %105 = vector.multi_reduction <add>, %104, %cst_60 [1] : vector<8x128xf32> to vector<8xf32>
      %106 = vector.shape_cast %105 : vector<8xf32> to vector<8x1xf32>
      %c0_61 = arith.constant 0 : index
      %c0_62 = arith.constant 0 : index
      %107 = vector.load %arg14[%c0_61, %c0_62] : memref<8x1xf32, #tpu.memory_space<vmem>>, vector<8x1xf32>
      tpu.vector_store %arg14[%c0_61, %c0_62], %106 {strides = array<i32>} : memref<8x1xf32, #tpu.memory_space<vmem>>, vector<8x1xf32>,
    } else {
    }
    %cst_16 = arith.constant -1.000000e+30 : f32
    %36 = vector.shape_cast %14 : vector<1x128xi1> to vector<1x128xi1>
    %37 = vector.broadcast %36 : vector<1x128xi1> to vector<8x128xi1>
    %38 = vector.broadcast %cst_16 : f32 to vector<8x128xf32>
    %39 = arith.select %37, %7, %38 : vector<8x128xi1>, vector<8x128xf32>
    %cst_17 = arith.constant dense<0xFF800000> : vector<8xf32>
    %40 = vector.multi_reduction <maximumf>, %39, %cst_17 [1] : vector<8x128xf32> to vector<8xf32>
    %41 = vector.shape_cast %40 : vector<8xf32> to vector<8x1xf32>
    %c0_18 = arith.constant 0 : index
    %c0_19 = arith.constant 0 : index
    %42 = vector.load %arg9[%c0_18, %c0_19] : memref<8x1xf32, #tpu.memory_space<vmem>>, vector<8x1xf32>
    %43 = arith.maximumf %42, %41 : vector<8x1xf32>
    %44 = arith.subf %42, %43 : vector<8x1xf32>
    %45 = math.exp %44 : vector<8x1xf32>
    %46 = vector.broadcast %43 : vector<8x1xf32> to vector<8x128xf32>
    %47 = arith.subf %39, %46 : vector<8x128xf32>
    %48 = math.exp %47 : vector<8x128xf32>
    %c0_20 = arith.constant 0 : index
    %c0_21 = arith.constant 0 : index
    %49 = vector.load %arg10[%c0_20, %c0_21] : memref<8x1xf32, #tpu.memory_space<vmem>>, vector<8x1xf32>
    %50 = arith.mulf %45, %49 : vector<8x1xf32>
    %cst_22 = arith.constant dense<0.000000e+00> : vector<8xf32>
    %51 = vector.multi_reduction <add>, %48, %cst_22 [1] : vector<8x128xf32> to vector<8xf32>
    %52 = vector.shape_cast %51 : vector<8xf32> to vector<8x1xf32>
    %53 = arith.addf %50, %52 : vector<8x1xf32>
    %c0_23 = arith.constant 0 : index
    %c0_24 = arith.constant 0 : index
    %54 = vector.load %arg10[%c0_23, %c0_24] : memref<8x1xf32, #tpu.memory_space<vmem>>, vector<8x1xf32>
    tpu.vector_store %arg10[%c0_23, %c0_24], %53 {strides = array<i32>} : memref<8x1xf32, #tpu.memory_space<vmem>>, vector<8x1xf32>,
    %c0_25 = arith.constant 0 : index
    %c0_26 = arith.constant 0 : index
    %55 = vector.load %arg11[%c0_25, %c0_26] : memref<8x1xf32, #tpu.memory_space<vmem>>, vector<8x1xf32>
    %56 = arith.mulf %45, %55 : vector<8x1xf32>
    %cst_27 = arith.constant 0.000000e+00 : f32
    %57 = vector.broadcast %cst_27 : f32 to vector<8x128xf32>
    %58 = arith.select %30, %48, %57 : vector<8x128xi1>, vector<8x128xf32>
    %cst_28 = arith.constant dense<0.000000e+00> : vector<8xf32>
    %59 = vector.multi_reduction <add>, %58, %cst_28 [1] : vector<8x128xf32> to vector<8xf32>
    %60 = vector.shape_cast %59 : vector<8xf32> to vector<8x1xf32>
    %61 = arith.addf %56, %60 : vector<8x1xf32>
    %c0_29 = arith.constant 0 : index
    %c0_30 = arith.constant 0 : index
    %62 = vector.load %arg11[%c0_29, %c0_30] : memref<8x1xf32, #tpu.memory_space<vmem>>, vector<8x1xf32>
    tpu.vector_store %arg11[%c0_29, %c0_30], %61 {strides = array<i32>} : memref<8x1xf32, #tpu.memory_space<vmem>>, vector<8x1xf32>,
    %c0_31 = arith.constant 0 : index
    %c0_32 = arith.constant 0 : index
    %63 = vector.load %arg12[%c0_31, %c0_32] : memref<8x1xf32, #tpu.memory_space<vmem>>, vector<8x1xf32>
    %cst_33 = arith.constant 0.000000e+00 : f32
    %64 = vector.broadcast %cst_33 : f32 to vector<8x128xf32>
    %65 = arith.select %30, %7, %64 : vector<8x128xi1>, vector<8x128xf32>
    %cst_34 = arith.constant dense<0.000000e+00> : vector<8xf32>
    %66 = vector.multi_reduction <add>, %65, %cst_34 [1] : vector<8x128xf32> to vector<8xf32>
    %67 = vector.shape_cast %66 : vector<8xf32> to vector<8x1xf32>
    %68 = arith.addf %63, %67 : vector<8x1xf32>
    %c0_35 = arith.constant 0 : index
    %c0_36 = arith.constant 0 : index
    %69 = vector.load %arg12[%c0_35, %c0_36] : memref<8x1xf32, #tpu.memory_space<vmem>>, vector<8x1xf32>
    tpu.vector_store %arg12[%c0_35, %c0_36], %68 {strides = array<i32>} : memref<8x1xf32, #tpu.memory_space<vmem>>, vector<8x1xf32>,
    %c0_37 = arith.constant 0 : index
    %c0_38 = arith.constant 0 : index
    %70 = vector.load %arg13[%c0_37, %c0_38] : memref<8x1xf32, #tpu.memory_space<vmem>>, vector<8x1xf32>
    %cst_39 = arith.constant 1.000000e+00 : f32
    %cst_40 = arith.constant 0.000000e+00 : f32
    %71 = vector.broadcast %cst_39 : f32 to vector<8x128xf32>
    %72 = vector.broadcast %cst_40 : f32 to vector<8x128xf32>
    %73 = arith.select %30, %71, %72 : vector<8x128xi1>, vector<8x128xf32>
    %cst_41 = arith.constant dense<0.000000e+00> : vector<8xf32>
    %74 = vector.multi_reduction <add>, %73, %cst_41 [1] : vector<8x128xf32> to vector<8xf32>
    %75 = vector.shape_cast %74 : vector<8xf32> to vector<8x1xf32>
    %76 = arith.addf %70, %75 : vector<8x1xf32>
    %c0_42 = arith.constant 0 : index
    %c0_43 = arith.constant 0 : index
    %77 = vector.load %arg13[%c0_42, %c0_43] : memref<8x1xf32, #tpu.memory_space<vmem>>, vector<8x1xf32>
    tpu.vector_store %arg13[%c0_42, %c0_43], %76 {strides = array<i32>} : memref<8x1xf32, #tpu.memory_space<vmem>>, vector<8x1xf32>,
    %c0_44 = arith.constant 0 : index
    %c0_45 = arith.constant 0 : index
    %78 = vector.load %arg9[%c0_44, %c0_45] : memref<8x1xf32, #tpu.memory_space<vmem>>, vector<8x1xf32>
    tpu.vector_store %arg9[%c0_44, %c0_45], %43 {strides = array<i32>} : memref<8x1xf32, #tpu.memory_space<vmem>>, vector<8x1xf32>,
    %79 = vector.broadcast %11 : i32 to vector<1x128xi32>
    %80 = arith.addi %8, %79 : vector<1x128xi32>
    %81 = vector.broadcast %41 : vector<8x1xf32> to vector<8x128xf32>
    %82 = arith.cmpf oeq, %39, %81 : vector<8x128xf32>
    %c1073741824_i32 = arith.constant 1073741824 : i32
    %83 = vector.shape_cast %80 : vector<1x128xi32> to vector<1x128xi32>
    %84 = vector.broadcast %83 : vector<1x128xi32> to vector<8x128xi32>
    %85 = vector.broadcast %c1073741824_i32 : i32 to vector<8x128xi32>
    %86 = arith.select %82, %84, %85 : vector<8x128xi1>, vector<8x128xi32>
    %cst_46 = arith.constant dense<2147483647> : vector<8xi32>
    %87 = vector.multi_reduction <minsi>, %86, %cst_46 [1] : vector<8x128xi32> to vector<8xi32>
    %88 = vector.shape_cast %87 : vector<8xi32> to vector<8x1xi32>
    %c0_47 = arith.constant 0 : index
    %c0_48 = arith.constant 0 : index
    %89 = vector.load %arg15[%c0_47, %c0_48] : memref<8x1xf32, #tpu.memory_space<vmem>>, vector<8x1xf32>
    %90 = arith.cmpf ogt, %41, %89 : vector<8x1xf32>
    %c0_49 = arith.constant 0 : index
    %c0_50 = arith.constant 0 : index
    %91 = vector.load %arg15[%c0_49, %c0_50] : memref<8x1xf32, #tpu.memory_space<vmem>>, vector<8x1xf32>
    %92 = arith.select %90, %41, %91 : vector<8x1xi1>, vector<8x1xf32>
    %c0_51 = arith.constant 0 : index
    %c0_52 = arith.constant 0 : index
    %93 = vector.load %arg15[%c0_51, %c0_52] : memref<8x1xf32, #tpu.memory_space<vmem>>, vector<8x1xf32>
    tpu.vector_store %arg15[%c0_51, %c0_52], %92 {strides = array<i32>} : memref<8x1xf32, #tpu.memory_space<vmem>>, vector<8x1xf32>,
    %c0_53 = arith.constant 0 : index
    %c0_54 = arith.constant 0 : index
    %94 = vector.load %arg16[%c0_53, %c0_54] : memref<8x1xi32, #tpu.memory_space<vmem>>, vector<8x1xi32>
    %95 = arith.select %90, %88, %94 : vector<8x1xi1>, vector<8x1xi32>
    %c0_55 = arith.constant 0 : index
    %c0_56 = arith.constant 0 : index
    %96 = vector.load %arg16[%c0_55, %c0_56] : memref<8x1xi32, #tpu.memory_space<vmem>>, vector<8x1xi32>
    tpu.vector_store %arg16[%c0_55, %c0_56], %95 {strides = array<i32>} : memref<8x1xi32, #tpu.memory_space<vmem>>, vector<8x1xi32>,
    %c0_i32_57 = arith.constant 0 : i32
    %97 = arith.cmpi eq, %arg1, %c0_i32_57 : i32
    %98 = arith.extui %97 : i1 to i32
    %c0_i32_58 = arith.constant 0 : i32
    %99 = arith.cmpi ne, %98, %c0_i32_58 : i32
    scf.if %99 {
      %100 = tpu.iota {dimensions = array<i32: 1>} : vector<8x128xi32>
      %c0_59 = arith.constant 0 : index
      %c0_60 = arith.constant 0 : index
      %101 = vector.load %arg9[%c0_59, %c0_60] : memref<8x1xf32, #tpu.memory_space<vmem>>, vector<8x1xf32>
      %c0_61 = arith.constant 0 : index
      %c0_62 = arith.constant 0 : index
      %102 = vector.load %arg10[%c0_61, %c0_62] : memref<8x1xf32, #tpu.memory_space<vmem>>, vector<8x1xf32>
      %c0_63 = arith.constant 0 : index
      %c0_64 = arith.constant 0 : index
      %103 = vector.load %arg11[%c0_63, %c0_64] : memref<8x1xf32, #tpu.memory_space<vmem>>, vector<8x1xf32>
      %c0_65 = arith.constant 0 : index
      %c0_66 = arith.constant 0 : index
      %104 = vector.load %arg12[%c0_65, %c0_66] : memref<8x1xf32, #tpu.memory_space<vmem>>, vector<8x1xf32>
      %c0_67 = arith.constant 0 : index
      %c0_68 = arith.constant 0 : index
      %105 = vector.load %arg13[%c0_67, %c0_68] : memref<8x1xf32, #tpu.memory_space<vmem>>, vector<8x1xf32>
      %c0_69 = arith.constant 0 : index
      %c0_70 = arith.constant 0 : index
      %106 = vector.load %arg14[%c0_69, %c0_70] : memref<8x1xf32, #tpu.memory_space<vmem>>, vector<8x1xf32>
      %c0_71 = arith.constant 0 : index
      %c0_72 = arith.constant 0 : index
      %107 = vector.load %arg15[%c0_71, %c0_72] : memref<8x1xf32, #tpu.memory_space<vmem>>, vector<8x1xf32>
      %c0_73 = arith.constant 0 : index
      %c0_74 = arith.constant 0 : index
      %108 = vector.load %arg16[%c0_73, %c0_74] : memref<8x1xi32, #tpu.memory_space<vmem>>, vector<8x1xi32>
      %109 = arith.sitofp %108 : vector<8x1xi32> to vector<8x1xf32>
      %cst_75 = arith.constant 0.000000e+00 : f32
      %110 = vector.broadcast %cst_75 : f32 to vector<8x128xf32>
      %c0_i32_76 = arith.constant 0 : i32
      %111 = vector.broadcast %c0_i32_76 : i32 to vector<8x128xi32>
      %112 = arith.cmpi eq, %100, %111 : vector<8x128xi32>
      %113 = vector.shape_cast %101 : vector<8x1xf32> to vector<8x1xf32>
      %114 = vector.broadcast %113 : vector<8x1xf32> to vector<8x128xf32>
      %115 = arith.select %112, %114, %110 : vector<8x128xi1>, vector<8x128xf32>
      %c1_i32_77 = arith.constant 1 : i32
      %116 = vector.broadcast %c1_i32_77 : i32 to vector<8x128xi32>
      %117 = arith.cmpi eq, %100, %116 : vector<8x128xi32>
      %118 = vector.shape_cast %102 : vector<8x1xf32> to vector<8x1xf32>
      %119 = vector.broadcast %118 : vector<8x1xf32> to vector<8x128xf32>
      %120 = arith.select %117, %119, %115 : vector<8x128xi1>, vector<8x128xf32>
      %c2_i32 = arith.constant 2 : i32
      %121 = vector.broadcast %c2_i32 : i32 to vector<8x128xi32>
      %122 = arith.cmpi eq, %100, %121 : vector<8x128xi32>
      %123 = vector.shape_cast %103 : vector<8x1xf32> to vector<8x1xf32>
      %124 = vector.broadcast %123 : vector<8x1xf32> to vector<8x128xf32>
      %125 = arith.select %122, %124, %120 : vector<8x128xi1>, vector<8x128xf32>
      %c3_i32 = arith.constant 3 : i32
      %126 = vector.broadcast %c3_i32 : i32 to vector<8x128xi32>
      %127 = arith.cmpi eq, %100, %126 : vector<8x128xi32>
      %128 = vector.shape_cast %104 : vector<8x1xf32> to vector<8x1xf32>
      %129 = vector.broadcast %128 : vector<8x1xf32> to vector<8x128xf32>
      %130 = arith.select %127, %129, %125 : vector<8x128xi1>, vector<8x128xf32>
      %c4_i32 = arith.constant 4 : i32
      %131 = vector.broadcast %c4_i32 : i32 to vector<8x128xi32>
      %132 = arith.cmpi eq, %100, %131 : vector<8x128xi32>
      %133 = vector.shape_cast %105 : vector<8x1xf32> to vector<8x1xf32>
      %134 = vector.broadcast %133 : vector<8x1xf32> to vector<8x128xf32>
      %135 = arith.select %132, %134, %130 : vector<8x128xi1>, vector<8x128xf32>
      %c5_i32 = arith.constant 5 : i32
      %136 = vector.broadcast %c5_i32 : i32 to vector<8x128xi32>
      %137 = arith.cmpi eq, %100, %136 : vector<8x128xi32>
      %138 = vector.shape_cast %106 : vector<8x1xf32> to vector<8x1xf32>
      %139 = vector.broadcast %138 : vector<8x1xf32> to vector<8x128xf32>
      %140 = arith.select %137, %139, %135 : vector<8x128xi1>, vector<8x128xf32>
      %c6_i32 = arith.constant 6 : i32
      %141 = vector.broadcast %c6_i32 : i32 to vector<8x128xi32>
      %142 = arith.cmpi eq, %100, %141 : vector<8x128xi32>
      %143 = vector.shape_cast %107 : vector<8x1xf32> to vector<8x1xf32>
      %144 = vector.broadcast %143 : vector<8x1xf32> to vector<8x128xf32>
      %145 = arith.select %142, %144, %140 : vector<8x128xi1>, vector<8x128xf32>
      %c7_i32 = arith.constant 7 : i32
      %146 = vector.broadcast %c7_i32 : i32 to vector<8x128xi32>
      %147 = arith.cmpi eq, %100, %146 : vector<8x128xi32>
      %148 = vector.shape_cast %109 : vector<8x1xf32> to vector<8x1xf32>
      %149 = vector.broadcast %148 : vector<8x1xf32> to vector<8x128xf32>
      %150 = arith.select %147, %149, %145 : vector<8x128xi1>, vector<8x128xf32>
      %c0_78 = arith.constant 0 : index
      %c0_79 = arith.constant 0 : index
      %c0_80 = arith.constant 0 : index
      %151 = vector.load %arg8[%c0_78, %c0_79, %c0_80] : memref<1x8x128xf32, #tpu.memory_space<vmem>>, vector<1x8x128xf32>
      %152 = vector.shape_cast %151 : vector<1x8x128xf32> to vector<8x128xf32>
      %153 = vector.shape_cast %150 : vector<8x128xf32> to vector<1x8x128xf32>
      tpu.vector_store %arg8[%c0_78, %c0_79, %c0_80], %153 {strides = array<i32>} : memref<1x8x128xf32, #tpu.memory_space<vmem>>, vector<1x8x128xf32>,
    } else {
    }
    return
  }
  func.func @transform_0(%arg0: i32, %arg1: i32) -> (i32, i32) {
    %c0_i32 = arith.constant 0 : i32
    %c0_i32_0 = arith.constant 0 : i32
    %c0_i32_1 = arith.constant 0 : i32
    return %c0_i32, %c0_i32_0 : i32, i32
  }
  func.func @transform_1(%arg0: i32, %arg1: i32) -> (i32, i32) {
    %c1_i32 = arith.constant 1 : i32
    %0 = arith.muli %arg0, %c1_i32 : i32
    %1 = arith.addi %0, %arg1 : i32
    %c0_i32 = arith.constant 0 : i32
    %c0_i32_0 = arith.constant 0 : i32
    return %1, %c0_i32 : i32, i32
  }
  func.func @transform_2(%arg0: i32, %arg1: i32) -> (i32, i32) {
    %c0_i32 = arith.constant 0 : i32
    %c0_i32_0 = arith.constant 0 : i32
    %c0_i32_1 = arith.constant 0 : i32
    return %c0_i32, %c0_i32_0 : i32, i32
  }
  func.func @transform_3(%arg0: i32, %arg1: i32) -> (i32, i32) {
    %c0_i32 = arith.constant 0 : i32
    %c0_i32_0 = arith.constant 0 : i32
    %c0_i32_1 = arith.constant 0 : i32
    return %c0_i32, %c0_i32_0 : i32, i32
  }
  func.func @transform_4(%arg0: i32, %arg1: i32) -> (i32, i32) {
    %c1_i32 = arith.constant 1 : i32
    %0 = arith.muli %arg0, %c1_i32 : i32
    %1 = arith.addi %0, %arg1 : i32
    %c0_i32 = arith.constant 0 : i32
    %c0_i32_0 = arith.constant 0 : i32
    return %c0_i32, %1 : i32, i32
  }
  func.func @transform_5(%arg0: i32, %arg1: i32) -> (i32, i32) {
    %c1_i32 = arith.constant 1 : i32
    %0 = arith.muli %arg0, %c1_i32 : i32
    %1 = arith.addi %0, %arg1 : i32
    %c0_i32 = arith.constant 0 : i32
    %c0_i32_0 = arith.constant 0 : i32
    return %c0_i32, %1 : i32, i32
  }
  func.func @transform_6(%arg0: i32, %arg1: i32) -> (i32, i32, i32) {
    %c0_i32 = arith.constant 0 : i32
    %c0_i32_0 = arith.constant 0 : i32
    %c0_i32_1 = arith.constant 0 : i32
    return %arg0, %c0_i32, %c0_i32_0 : i32, i32, i32
  }
}

</mosaic_0001>

<bundles_post_ra>
// kernel: tpu_custom_call.1
= control target key start
LH: loop header
LB: loop body
LE: loop exit
PB: predicated region body
PF: predicated region fallthrough
CT: control target
= control target key end

     0   :  { %11 = vsyncpa [#allocation11], 0  ;;  %s1294_s0 = inlined_call_operand.vmem [shape: bf16[8,128], index: 0, kind: input, shape index: {}]   ;;  %s1295_s1 = inlined_call_operand.hbm [shape: bf16[256,128], index: 1, kind: input, shape index: {}]   ;;  %s1296_s2 = inlined_call_operand.vmem [shape: s32[8,1], index: 2, kind: input, shape index: {}]   ;;  %s1297_s3 = inlined_call_operand.vmem [shape: s32[8,1], index: 3, kind: input, shape index: {}]   ;;  %s1298_s4 = inlined_call_operand.vmem [shape: s32[1,256], index: 4, kind: input, shape index: {}]   ;;  %s1299_s5 = inlined_call_operand.vmem [shape: s32[1,256], index: 5, kind: input, shape index: {}]   ;;  %s1300_s6 = inlined_call_operand.hbm [shape: f32[2,8,128], index: 6, kind: output, shape index: {}]  }
   0x1   :  { %13 = vsyncpa [#allocation11 + $0x1], 0 }
   0x2   :  { %14 = vsyncpa [#allocation12], 0 }
   0x3   :  { %16 = vsyncpa [#allocation12 + $0x1], 0  ;;  %s1038_s21 = smov 0   ;;  %s1040_s22 = smov 0  }
   0x4   :  { %s1042_s23 = smov 0   ;;  %s1044_s24 = smov 0  }
   0x5   :  { %s1046_s25 = smov 0   ;;  %s1048_s26 = smov 0  }
   0x6 LB: > { %s744_s27 = sadd.s32 4294967295, %s993_s26   ;;  %s745_s28 = sadd.s32 4294967294, %s993_s26   ;;  %s993_s26 = sphi %s1048_s26, %s22_s26   ;;  %s989_s25 = sphi %s1046_s25, %s1313_s25   ;;  %s985_s24 = sphi %s1044_s24, %s1312_s24   ;;  %s981_s23 = sphi %s1042_s23, %s1311_s23   ;;  %s977_s22 = sphi %s1040_s22, %s1310_s22   ;;  %s973_s21 = sphi %s1038_s21, %s1309_s21  }
   0x7   : > { %s34_s29 = sadd.s32 1, %s989_s25  ;;  %s64_s30 = sadd.s32 1, %s981_s23 }
   0x8   : > { %p36_p0 = scmp.ge.s32.totalorder %s34_s29, 2  ;;  %p71_p1 = scmp.ne.s32.totalorder %s981_s23, %s977_s22 }
   0x9   : > { %p72_p2 = scmp.eq.s32.totalorder %s993_s26, 0  ;;  %p77_p3 = scmp.ne.s32.totalorder %s977_s22, %s973_s21 }
   0xa   : > { %s1315_s29 = smov (%p36_p0, %s34_s29), 0  ;;  %p78_p5 = scmp.eq.s32.totalorder %s744_s27, 0 }
   0xb   : > { %p1079_p4 = por %p72_p2, %p71_p1  ;;  %s61_s8 = ssub.s32 %s989_s25, %s1315_s29 }
   0xc   : > { %p199_p6 = scmp.eq.s32.totalorder %s744_s27, 1  ;;  %p62_p7 = scmp.eq.s32.totalorder %s61_s8, 0 }
   0xd   : > { %p1085_p8 = por %p78_p5, %p77_p3  ;;  %p205_p10 = scmp.eq.s32.totalorder %s745_s28, 1 }
   0xe   : > { %p1089_p9 = por %p199_p6, %p71_p1  ;;  %p814_p13 = scmp.lt.s32.totalorder %s993_s26, 2 }
   0xf   : > { %s1094_s11 = scalar_select %p62_p7, %s981_s23, %s64_s30  }
  0x10   : > { %p1096_p11 = por %p205_p10, %p77_p3  ;;  %s234_s13 = sand.u32 1, %s981_s23  }
  0x11   : > { %s748_s14 = sshll.u32 %s234_s13, 6  ;;  %s771_s15 = sshll.u32 %s989_s25, 10 }
  0x12   : > { %s245_s18 = scalar_lea.hbm %s1295_s1, %s771_s15  ;;  %s238_s19 = scalar_lea.vmem [#allocation10], %s748_s14 }
  0x13   : > { %s246_s20 = sshll.u32 %s238_s19, 4  ;;  %p1109_p0 = pnand %p814_p13, %p1079_p4  ;;  %s247_s20 = int_to_ptr.vmem [resolvable:$true] %s246_s20 }
  0x14   : > { %p751_p1 = scmp.ge.s32.totalorder %s993_s26, 1  ;;  %s235_s28 = scalar_lea.sflag [#allocation11], %s234_s13 }
  0x15   : > { %p887_p2 = pneg %p1109_p0  ;;  %s898_s30 = scalar_lea.vmem %s247_s20, 1024 }
  0x16   : > { %p899_p3 = scmp.ne.s32.totalorder %s247_s20, %s898_s30  ;;  %s995_s8 = smov [#allocation10]  }
  0x17   : > { %s903_s16 = sshll.u32 %s995_s8, 4  ;;  %s904_s16 = int_to_ptr.vmem [resolvable:$false] %s903_s16 }
  0x18   : > { %p901_p5 = pnand %p899_p3, %p887_p2  ;;  %s905_s14 = scalar_lea.vmem %s904_s16, 2048 }
  0x19   : > { %p906_p7 = scmp.lt.s32.totalorder %s247_s20, %s904_s16  ;;  %p907_p10 = scmp.lt.s32.totalorder %s905_s14, %s898_s30 }
  0x1a   : > { %p902_p6 = pneg %p901_p5 }
  0x1b   : > { %p908_p12 = por %p907_p10, %p906_p7 }
  0x1d   : > { %p909_p4 = pnand %p908_p12, %p902_p6 }
  0x1f   : > { %912 = shalt.err (!%p909_p4)
}
  0x20   : > { %s996_s7 = smov 64   ;;  %s997_s13 = smov 4  }
  0x21   : > { %809 = dma.hbm_to_vmem [thread:$0]  (!%p1109_p0), %s245_s18, 1024, %s247_s20, %s235_s28, %s996_s7, %s996_s7, %s997_s13  }
  0x22   : > { %p270_p13 = scmp.lt.s32.totalorder %s993_s26, 3 }
  0x24   : > { %p271_p2 = pnand %p751_p1, %p270_p13 }
  0x25   : > { %s1122_s15 = sand.u32 (!%p271_p2), 1, %s977_s22  }
  0x26   : > { %274 = sbr.rel (%p271_p2) target bundleno = 1036 (0x40c), region = 44  ;;  %s752_s17 = sshll.u32 (!%p271_p2), %s1122_s15, 6 }
  0x27   : > { %s277_s19 = scalar_lea.sflag (!%p271_p2), [#allocation11], %s1122_s15  ;;  %s1126_s30 = scalar_lea.vmem (!%p271_p2), [#allocation10], %s752_s17 }
  0x2b   : > { %964 = dma.done.wait (%p1085_p8), %s277_s19, 1024  }
  0x2c   : > { %966 = vsyncadd (%p1085_p8), %s277_s19, 4294966272  ;;  %s753_s18 = sshll.u32 %s1122_s15, 3  ;;  %vm334_vm0 = vcmask 7168   ;;  %v998_v0 = vmov 0.0   ;;  %vm999_vm1 = vmmov 0   ;;  %v1000_v1 = vmov 0  }
  0x2d   : > { %782 = vmatprep.subr.bf16.mxu0 %v998_v0  ;;  %798 = vmatprep.mubr.msk.bf16.mxu0 %vm999_vm1, %v998_v0  ;;  %336 = vst.msk [vmem:[#allocation3] sm:$0xff] %vm334_vm0, %v998_v0  ;;  %337 = vst.msk [vmem:[#allocation4] sm:$0xff] %vm334_vm0, %v998_v0  ;;  %v1001_v2 = vmov -1e+30   ;;  %v871_v3 = vld [vmem:[%s1126_s30 + $0x38] sm:$0xff]   ;;  %v872_v4 = vld [vmem:[%s1126_s30 + $0x30] sm:$0xff]   ;;  %v448_v15 = vlaneseq }
  0x2e   : > { %338 = vst.msk [vmem:[#allocation5] sm:$0xff] %vm334_vm0, %v998_v0  ;;  %339 = vst.msk [vmem:[#allocation6] sm:$0xff] %vm334_vm0, %v998_v0  ;;  %870 = vset.pattern.permute.xlu0 %v1000_v1  ;;  %783 = vmatpush3.bf16.xpose.msra.mxu0 %v871_v3  ;;  %v465_v5 = vld [vmem:[%s1297_s3] sm:$0xff]  ;;  %v873_v7 = vld [vmem:[%s1126_s30 + $0x28] sm:$0xff]   ;;  %p320_p8 = scmp.lt.s32.totalorder %s985_s24, 1  ;;  %s1180_s19 = sshll.u32 %s985_s24, 7 }
  0x2f   : > { %340 = vst.msk [vmem:[#allocation7] sm:$0xff] %vm334_vm0, %v998_v0  ;;  %342 = vst.msk [vmem:[#allocation9] sm:$0xff] %vm334_vm0, %v1000_v1  ;;  %784 = vmatprep.subr.bf16.mxu0 %v998_v0  ;;  %468 = vperm.xlu0 %870, %v465_v5   ;;  %v455_v6 = vld [vmem:[%s1296_s2] sm:$0xff]  ;;  %v875_v9 = vld [vmem:[%s1126_s30 + $0x18] sm:$0xff]   ;;  %s452_s27 = ssub.s32 200, %s1180_s19  ;;  %v1186_v18 = vand.u32 127, %v448_v15 }
  0x30   : > { %335 = vst.msk [vmem:[#allocation2] sm:$0xff] %vm334_vm0, %v1001_v2  ;;  %341 = vst.msk [vmem:[#allocation8] sm:$0xff] %vm334_vm0, %v1001_v2  ;;  %v874_v8 = vld [vmem:[%s1126_s30 + $0x20] sm:$0xff]   ;;  %v876_v10 = vld [vmem:[%s1126_s30 + $0x10] sm:$0xff]   ;;  %s321_s14 = scalar_select %p320_p8, %s985_s24, 1  ;;  %v453_v21 = vstv %s452_s27 }
  0x31   : > { %v877_v11 = vld [vmem:[%s1126_s30 + $0x8] sm:$0xff]   ;;  %v878_v12 = vld [vmem:[%s1126_s30] sm:$0xff]   ;;  %p483_p12 = scmp.eq.s32.totalorder %s985_s24, 0  ;;  %vm454_vm3 = vcmp.lt.s32.totalorder %v1186_v18, %v453_v21  ;;  %s1198_s28 = scalar_lea.vmem [#allocation13], %s753_s18 }
  0x32   : > { %v343_v13 = vld [vmem:[%s1294_s0] sm:$0xf]  ;;  %s327_s17 = scalar_lea.vmem %s1299_s5, %s321_s14  ;;  %s322_s20 = scalar_lea.vmem %s1298_s4, %s321_s14  ;;  %v489_v29 = vshrl.u32 (%p483_p12), %v448_v15, 7 }
  0x33   : > { %458 = vperm.xlu0 %870, %v455_v6   ;;  %v764_v14 = vld [vmem:[%s327_s17] ss:$0 sm:$0xff] }
  0x34   : > { %v763_v19 = vld [vmem:[%s322_s20] ss:$0 sm:$0xff]  ;;  %vm490_vm7 = vcmp.eq.s32.totalorder (%p483_p12), %v1186_v18, %v489_v29 }
  0x36   : > { %785 = vmatpush3.bf16.xpose.msra.mxu0 %v872_v4 }
  0x37   : > { %786 = vmatprep.subr.bf16.mxu0 %v998_v0 }
  0x3e   : > { %787 = vmatpush3.bf16.xpose.msra.mxu0 %v873_v7 }
  0x3f   : > { %788 = vmatprep.subr.bf16.mxu0 %v998_v0 }
  0x46   : > { %789 = vmatpush3.bf16.xpose.msra.mxu0 %v874_v8 }
  0x47   : > { %790 = vmatprep.subr.bf16.mxu0 %v998_v0 }
  0x4e   : > { %791 = vmatpush3.bf16.xpose.msra.mxu0 %v875_v9 }
  0x4f   : > { %792 = vmatprep.subr.bf16.mxu0 %v998_v0 }
  0x56   : > { %793 = vmatpush3.bf16.xpose.msra.mxu0 %v876_v10 }
  0x57   : > { %794 = vmatprep.subr.bf16.mxu0 %v998_v0 }
  0x5e   : > { %795 = vmatpush3.bf16.xpose.msra.mxu0 %v877_v11 }
  0x5f   : > { %796 = vmatprep.subr.bf16.mxu0 %v998_v0 }
  0x66   : > { %797 = vmatpush3.bf16.xpose.msra.mxu0 %v878_v12 }
  0x6d   : > { %799 = vmatmul.mubr.bf16.vlgmr.msra.gmra.mxu0 %v343_v13 }
  0xaa   : > { %v469_v16 = vpop.permute.xlu0 %468 }
  0xab   : > { %v474_v17 = vsub.s32 %v469_v16, %v764_v14 }
  0xad   : > { %v476_v20 = vsub.s32 0, %v474_v17 }
  0xae   : > { %v459_v22 = vpop.permute.xlu0 %458 }
  0xaf   : > { %v765_v23 = vmin.u32 %v476_v20, %v474_v17  ;;  %vm464_vm2 = vcmp.eq.s32.totalorder %v459_v22, %v763_v19 }
  0xb1   : > { %vm478_vm4 = vcmp.le.s32.totalorder %v765_v23, 8 }
  0xb2   : > { %vm479_vm5 = vmand %vm464_vm2, %vm478_vm4 }
  0xb3   : > { %vm1192_vm6 = vmand %vm479_vm5, %vm454_vm3 }
 0x12d   : > { %v442_v25 = vpop.f32.mrf.mxu0 }
 0x12e   : > { %v491_v30 = vsel (%p483_p12), %vm490_vm7, %v442_v25, 0.0 }
 0x12f   : > { %v800_v26 = vpop.f32.mrf.mxu0  ;;  %487 = sbr.rel (!%p483_p12) target bundleno = 442 (0x1ba), region = 56  ;;  %492 = vadd.xlane.f32.xlu0 (%p483_p12), %v491_v30 }
 0x131   : > { %v445_v27 = vpop.f32.mrf.mxu0 }
 0x133   : > { %v801_v28 = vpop.f32.mrf.mxu0 }
 0x1b8   : > { %v493_v31 = vpop.xlane.xlu0 %492 }
 0x1b9   : > { %495 = vst.msk [vmem:[#allocation7] sm:$0xff] %vm334_vm0, %v493_v31 }
 0x1ba PF: > { %v496_v32 = vsel %vm454_vm3, %v442_v25, -1e+30  ;;  %879 = vset.pattern.permute.xlu0 %v1000_v1  ;;  %880 = vset.pattern.permute.xlu1 %v1000_v1  ;;  %v539_v33 = vstv %s1180_s19  ;;  %v1207_v34 = vld [vmem:[#allocation8] sm:$0xff]  ;;  %v499_v35 = vld [vmem:[#allocation2] sm:$0xff]  ;;  %v527_v44 = vsel %vm1192_vm6, %v442_v25, 0.0  ;;  %v526_v50 = vld [vmem:[#allocation5] sm:$0xff]  ;;  %s1251_s16 = scalar_lea.hbm %s1300_s6, %s1180_s19 }
 0x1bb   : > { %497 = vmax.xlane.f32.xlu0 %v496_v32  ;;  %v540_v36 = vadd.s32 %v539_v33, %v1186_v18  ;;  %v533_v57 = vsel %vm1192_vm6, 1.0, %v998_v0  ;;  %v512_v63 = vld [vmem:[#allocation3] sm:$0xff]  ;;  %v519_v3 = vld [vmem:[#allocation4] sm:$0xff]  ;;  %v561_v11 = vld [vmem:[#allocation9] sm:$0xff]  ;;  %vm576_vm11 = vcmp.eq.s32.totalorder %v1186_v18, 0  ;;  %vm583_vm12 = vcmp.eq.s32.totalorder %v1186_v18, 1 }
 0x1bc   : > { %v532_v12 = vld [vmem:[#allocation6] sm:$0xff]  ;;  %vm590_vm13 = vcmp.eq.s32.totalorder %v1186_v18, 2  ;;  %vm597_vm14 = vcmp.eq.s32.totalorder %v1186_v18, 3  ;;  %vm604_vm15 = vcmp.eq.s32.totalorder %v1186_v18, 4  ;;  %vm618_vm1 = vcmp.eq.s32.totalorder %v1186_v18, 6  ;;  %s647_s24 = sshll.u32 %s1198_s28, 4  ;;  %s648_s24 = int_to_ptr.vmem [resolvable:$true] %s647_s24 }
 0x1bd   : > { %vm625_vm2 = vcmp.eq.s32.totalorder %v1186_v18, 7  ;;  %s634_s14 = scalar_lea.sflag [#allocation12], %s1122_s15  ;;  %s913_s7 = scalar_lea.vmem %s648_s24, 128 }
 0x1be   : > { %p914_p0 = scmp.ne.s32.totalorder %s648_s24, %s913_s7  ;;  %s1002_s13 = smov [#allocation13]  }
 0x1bf   : > { %s917_s17 = sshll.u32 %s1002_s13, 4  ;;  %s918_s17 = int_to_ptr.vmem [resolvable:$false] %s917_s17 }
 0x1c0   : > { %v572_v59 = vld [vmem:[#allocation7] sm:$0xff]  ;;  %p915_p1 = pnand %p914_p0, %p1089_p9  ;;  %s919_s9 = scalar_lea.vmem %s918_s17, 256 }
 0x1c1   : > { %p920_p5 = scmp.lt.s32.totalorder %s648_s24, %s918_s17  ;;  %p921_p6 = scmp.lt.s32.totalorder %s919_s9, %s913_s7 }
 0x1c2   : > { %p916_p3 = pneg %p915_p1 }
 0x1c3   : > { %p922_p7 = por %p921_p6, %p920_p5 }
 0x1c5   : > { %p923_p10 = pnand %p922_p7, %p916_p3 }
 0x244   : > { %v1210_v37 = vpop.xlane.xlu0 %497 }
 0x245   : > { %vm558_vm8 = vcmp.gt.f32.partialorder %v1210_v37, %v1207_v34  ;;  %v500_v38 = vmax.f32 %v499_v35, %v1210_v37  ;;  %vm541_vm9 = vcmp.eq.f32.partialorder %v496_v32, %v1210_v37 }
 0x246   : > { %v559_v39 = vsel %vm558_vm8, %v1210_v37, %v1207_v34  ;;  %v542_v40 = vsel %vm541_vm9, %v540_v36, 1073741824 }
 0x247   : > { %560 = vst.msk [vmem:[#allocation8] sm:$0xff] %vm334_vm0, %v559_v39  ;;  %506 = vperm.xlu0 %879, %v500_v38   ;;  %v501_v41 = vsub.f32 %v499_v35, %v500_v38  ;;  %538 = vst.msk [vmem:[#allocation2] sm:$0xff] %vm334_vm0, %v500_v38  ;;  %v544_v42 = vshra.s32 %v542_v40, 16  ;;  %v543_v51 = vand.u32 65535, %v542_v40 }
 0x249   : > { %v546_v43 = vcvt.s32.f32 %v544_v42  ;;  %v545_v55 = vcvt.s32.f32 %v543_v51  ;;  %v502_v61 = vmul.f32 1.442695, %v501_v41 }
 0x24b   : > { %547 = vmin.xlane.f32.xlu1 %v546_v43 }
 0x24e   : > { %v567_v60 = vld [vmem:[#allocation2] sm:$0xff]  ;;  %v573_v23 = vld [vmem:[#allocation8] sm:$0xff] }
 0x24f   : > { %528 = vadd.xlane.f32.xlu1 %v527_v44 }
 0x2c2   : > { %v507_v45 = vpop.permute.xlu0 %506 }
 0x2c3   : > { %v509_v46 = vsub.f32 %v496_v32, %v507_v45 }
 0x2c5   : > { %v510_v47 = vmul.f32 1.442695, %v509_v46 }
 0x2c7   : > { %881 = vpow2.f32 %v510_v47 }
 0x2c8   : > { %883 = vpow2.f32 %v502_v61 }
 0x2d4   : > { %v882_v48 = vpop.eup %881  ;;  %v548_v49 = vpop.xlane.xlu1 %547 }
 0x2d5   : > { %514 = vadd.xlane.f32.xlu1 %v882_v48  ;;  %v521_v53 = vsel %vm1192_vm6, %v882_v48, 0.0  ;;  %vm549_vm10 = vcmp.eq.f32.partialorder %v546_v43, %v548_v49  ;;  %v884_v62 = vpop.eup %883  ;;  %v554_v0 = vcvt.f32.s32 %v548_v49 }
 0x2d6   : > { %v550_v56 = vsel %vm549_vm10, %v545_v55, inf  ;;  %v513_v1 = vmul.f32 %v884_v62, %v512_v63  ;;  %v520_v5 = vmul.f32 %v884_v62, %v519_v3 }
 0x2d7   : > { %v555_v9 = vshll.u32 %v554_v0, 16 }
 0x2d8   : > { %v529_v52 = vpop.xlane.xlu1 %528 }
 0x2d9   : > { %v530_v54 = vadd.f32 %v529_v52, %v526_v50  ;;  %522 = vadd.xlane.f32.xlu1 %v521_v53 }
 0x2db   : > { %531 = vst.msk [vmem:[#allocation5] sm:$0xff] %vm334_vm0, %v530_v54 }
 0x2dd   : > { %551 = vmin.xlane.f32.xlu1 %v550_v56 }
 0x2e1   : > { %534 = vadd.xlane.f32.xlu1 %v533_v57 }
 0x2e2   : > { %v570_v58 = vld [vmem:[#allocation5] sm:$0xff] }
 0x2e3   : > { %600 = vperm.xlu0 %879, %v570_v58  }
 0x2e7   : > { %614 = vperm.xlu0 %879, %v572_v59  }
 0x2f2   : > { %579 = vperm.xlu1 %880, %v567_v60  }
 0x35e   : > { %v515_v2 = vpop.xlane.xlu1 %514  ;;  %v601_v26 = vpop.permute.xlu0 %600 }
 0x35f   : > { %v516_v4 = vadd.f32 %v515_v2, %v513_v1 }
 0x361   : > { %518 = vst.msk [vmem:[#allocation3] sm:$0xff] %vm334_vm0, %v516_v4 }
 0x362   : > { %v523_v6 = vpop.xlane.xlu1 %522  ;;  %v615_v31 = vpop.permute.xlu0 %614 }
 0x363   : > { %v524_v7 = vadd.f32 %v523_v6, %v520_v5 }
 0x365   : > { %525 = vst.msk [vmem:[#allocation4] sm:$0xff] %vm334_vm0, %v524_v7 }
 0x366   : > { %v552_v8 = vpop.xlane.xlu1 %551 }
 0x367   : > { %v553_v10 = vcvt.f32.s32 %v552_v8 }
 0x368   : > { %v568_v21 = vld [vmem:[#allocation3] sm:$0xff] }
 0x369   : > { %v556_v13 = vadd.s32 %v555_v9, %v553_v10 }
 0x36a   : > { %v535_v14 = vpop.xlane.xlu1 %534 }
 0x36b   : > { %v562_v15 = vsel %vm558_vm8, %v556_v13, %v561_v11  ;;  %v536_v16 = vadd.f32 %v535_v14, %v532_v12 }
 0x36c   : > { %563 = vst.msk [vmem:[#allocation9] sm:$0xff] %vm334_vm0, %v562_v15  ;;  %v569_v22 = vld [vmem:[#allocation4] sm:$0xff] }
 0x36d   : > { %537 = vst.msk [vmem:[#allocation6] sm:$0xff] %vm334_vm0, %v536_v16  ;;  %vm611_vm0 = vcmp.eq.s32.totalorder %v1186_v18, 5 }
 0x36e   : > { %v580_v24 = vpop.permute.xlu1 %579 }
 0x36f   : > { %v582_v28 = vsel %vm576_vm11, %v580_v24, 0.0 }
 0x373   : > { %v574_v17 = vld [vmem:[#allocation9] sm:$0xff] }
 0x374   : > { %v571_v19 = vld [vmem:[#allocation6] sm:$0xff]  ;;  %v575_v20 = vcvt.s32.f32 %v574_v17 }
 0x375   : > { %607 = vperm.xlu1 %880, %v571_v19  }
 0x376   : > { %628 = vperm.xlu0 %879, %v575_v20  }
 0x379   : > { %586 = vperm.xlu1 %880, %v568_v21  }
 0x37d   : > { %593 = vperm.xlu1 %880, %v569_v22  }
 0x381   : > { %621 = vperm.xlu1 %880, %v573_v23  }
 0x3f0   : > { %v608_v25 = vpop.permute.xlu1 %607 }
 0x3f1   : > { %v629_v37 = vpop.permute.xlu0 %628 }
 0x3f4   : > { %v587_v27 = vpop.permute.xlu1 %586 }
 0x3f5   : > { %v589_v29 = vsel %vm583_vm12, %v587_v27, %v582_v28 }
 0x3f8   : > { %v594_v30 = vpop.permute.xlu1 %593 }
 0x3f9   : > { %v596_v32 = vsel %vm590_vm13, %v594_v30, %v589_v29 }
 0x3fa   : > { %v603_v33 = vsel %vm597_vm14, %v601_v26, %v596_v32 }
 0x3fb   : > { %v610_v34 = vsel %vm604_vm15, %v608_v25, %v603_v33 }
 0x3fc   : > { %v617_v35 = vsel %vm611_vm0, %v615_v31, %v610_v34  ;;  %v622_v36 = vpop.permute.xlu1 %621 }
 0x3fd   : > { %v624_v38 = vsel %vm618_vm1, %v622_v36, %v617_v35 }
 0x3fe   : > { %v631_v39 = vsel %vm625_vm2, %v629_v37, %v624_v38 }
 0x3ff   : > { %632 = vst [vmem:[%s1198_s28] sm:$0xff] %v631_v39 }
 0x400   : > { %926 = shalt.err (!%p923_p10)
}
 0x401   : > { %s927_s19 = scalar_lea.hbm %s1251_s16, 128  ;;  %s931_s20 = scalar_lea.hbm %s1300_s6, 256 }
 0x402   : > { %p928_p4 = scmp.ne.s32.totalorder %s1251_s16, %s927_s19  ;;  %p932_p8 = scmp.lt.s32.totalorder %s1251_s16, %s1300_s6 }
 0x403   : > { %p933_p12 = scmp.lt.s32.totalorder %s931_s20, %s927_s19 }
 0x404   : > { %p929_p13 = pnand %p928_p4, %p1089_p9 }
 0x405   : > { %p934_p0 = por %p933_p12, %p932_p8 }
 0x406   : > { %p930_p2 = pneg %p929_p13 }
 0x408   : > { %p935_p1 = pnand %p934_p0, %p930_p2 }
 0x40a   : > { %938 = shalt.err (!%p935_p1)
}
 0x40b   : > { %804 = dma.vmem_to_hbm [thread:$0]  (%p1089_p9), %s648_s24, 128, %s1251_s16, %s634_s14  }
 0x40c PF: > { %s659_s18 = sand.u32 1, %s973_s21   ;;  %p1308_p3 = scmp.ge.s32.totalorder %s993_s26, 2 }
 0x40d   : > { %s660_s8 = scalar_lea.sflag [#allocation12], %s659_s18 }
 0x40e   : > { %p811_p5 = pnand %p1308_p3, %p1096_p11 }
 0x410   : > { %p812_p6 = pneg %p811_p5 }
 0x412   : > { %968 = dma.done.wait (%p812_p6), %s660_s8, 128  }
 0x413   : > { %970 = vsyncadd (%p812_p6), %s660_s8, 4294967168  ;;  %s22_s26 = sadd.s32 1, %s993_s26   ;;  %s1309_s21 = smov %s977_s22 }
 0x414   : > { %p19_p7 = scmp.ge.s32.totalorder %s22_s26, 4   ;;  %s1310_s22 = smov %s981_s23 }
 0x415   : > { %s1311_s23 = smov %s1094_s11  ;;  %s1312_s24 = smov %s989_s25 }
 0x416   : > { %s1313_s25 = smov %s1315_s29  ;;  %21 = sbr.rel (!%p19_p7) target bundleno = 6 (0x6), region = 107 }
 0x41b   :  { %665 = vsyncpa [#allocation11], 1 }
 0x41c   :  { %667 = vsyncpa [#allocation11 + $0x1], 1 }
 0x41d   :  { %668 = vsyncpa [#allocation12], 1 }
 0x41e   :  { %670 = vsyncpa [#allocation12 + $0x1], 1 }

</bundles_post_ra>
